<compile_context>
chip_gen: v7x
topology: tpu7x:2x2x1
jax: 0.10.0
libtpu: 0.0.40
codegen_flags: <defaults>
</compile_context>

<pallas_src>
import functools

import jax
import jax.numpy as jnp
from jax.experimental import pallas as pl
from jax.experimental.pallas import tpu as pltpu

_W = 1024             # lane-dense slab width (8 * 128)
_MAX_ROW_BLOCK = 256  # 256 * 1024 * 4 B = 1 MiB f32 per block per array


def _sublane_align(dtype) -> int:
    """Minimum second-to-last block dim for this dtype's sublane packing."""
    itemsize = jnp.dtype(dtype).itemsize
    if itemsize >= 4:
        return 8
    return 8 * (4 // itemsize)      # bf16/f16 -> 16, int8/u8 -> 32


def _tensorcores_per_chip() -> int:
    """Best-effort TensorCores-per-chip (v7x: 2, v5e/v6e: 1).  Perf-only; a
    wrong answer never affects correctness."""
    try:
        dev = jax.devices()[0]
        if dev.platform != "tpu":
            return 1
        if "v7" in str(getattr(dev, "device_kind", "")).lower():
            return 2
    except Exception:
        pass
    return 1


def _flatten_pad(a, rows_padded):
    """Flatten to a lane-dense (rows_padded, _W) slab in the array's NATIVE
    dtype.  Pads (one full copy) only when the element count is not already
    aligned; zero padding keeps the padded mask region at 0."""
    flat = a.reshape(-1)
    total = rows_padded * _W
    if total != flat.shape[0]:
        flat = jnp.pad(flat, (0, total - flat.shape[0]))
    return flat.reshape(rows_padded, _W)


def _masked_mse_sum_kernel(x_ref, y_ref, m_ref, lsum_ref, msum_ref, *,
                           rows_padded, row_block, nb_per_p, need_mask):
    """reduction='all': accumulate partial sums of loss*mask and mask.

    Accumulators are small (8, _W) f32 blocks resident in VMEM across the
    inner ('arbitrary') grid axis; the dense loss never touches HBM.
    """
    p = pl.program_id(0)
    i = pl.program_id(1)

    @pl.when(i == 0)
    def _():
        lsum_ref[...] = jnp.zeros_like(lsum_ref)
        msum_ref[...] = jnp.zeros_like(msum_ref)

    # Cast in-kernel (free VPU slack on an HBM-bound kernel); accumulate f32.
    x = x_ref[...].astype(jnp.float32)
    y = y_ref[...].astype(jnp.float32)
    m = m_ref[...].astype(jnp.float32)
    diff = x - y
    contrib = diff * diff * m

    if need_mask:
        # Zero rows past the (padded) array extent: garbage from a partially
        # out-of-bounds edge block (or a clamped duplicate block from the
        # parallel split) must not leak into the sums (could be NaN/Inf).
        blk = p * nb_per_p + i                      # logical, unclamped
        row0 = blk * row_block
        row_ids = jax.lax.broadcasted_iota(jnp.int32, (row_block, _W), 0)
        valid = (row_ids + row0) < rows_padded
        contrib = jnp.where(valid, contrib, 0.0)
        m = jnp.where(valid, m, 0.0)

    # Per-step row reduce (pure VPU adds, keeps sublane structure) into the
    # small accumulators: tiny HBM writeback, trivial final jnp.sum.
    lsum_ref[...] += contrib.reshape(row_block // 8, 8, _W).sum(axis=0)
    msum_ref[...] += m.reshape(row_block // 8, 8, _W).sum(axis=0)


def _masked_mse_kernel(x_ref, y_ref, m_ref, o_ref):
    """reduction='none': dense elementwise loss, emitted in the output dtype."""
    x = x_ref[...].astype(jnp.float32)
    y = y_ref[...].astype(jnp.float32)
    m = m_ref[...].astype(jnp.float32)
    diff = x - y
    o_ref[...] = (diff * diff * m).astype(o_ref.dtype)


def mask_loss(x, y, mask, reduction="all"):
    """Pallas implementation of MaskLoss.forward with elementwise MSE."""
    assert x.shape == y.shape == mask.shape
    orig_shape = x.shape
    n = 1
    for d in orig_shape:
        n *= d

    if mask.dtype == jnp.bool_:
        mask = mask.astype(jnp.int8)  # exact for 0/1, still a narrow stream

    out_dtype = x.dtype
    align = max(_sublane_align(x.dtype), _sublane_align(y.dtype),
                _sublane_align(mask.dtype), _sublane_align(out_dtype))
    rows = pl.cdiv(n, _W)
    rows_padded = pl.cdiv(rows, align) * align      # minimal alignment pad
    row_block = min(_MAX_ROW_BLOCK, rows_padded)    # always a multiple of align
    nblocks = pl.cdiv(rows_padded, row_block)
    padded = rows_padded * _W != n

    xf = _flatten_pad(x, rows_padded)
    yf = _flatten_pad(y, rows_padded)
    mf = _flatten_pad(mask, rows_padded)

    if reduction == "none":
        spec = pl.BlockSpec((row_block, _W), lambda i: (i, 0))
        out = pl.pallas_call(
            _masked_mse_kernel,
            out_shape=jax.ShapeDtypeStruct((rows_padded, _W), out_dtype),
            grid_spec=pltpu.PrefetchScalarGridSpec(
                num_scalar_prefetch=0,
                grid=(nblocks,),
                in_specs=[spec, spec, spec],
                out_specs=spec,
            ),
            compiler_params=pltpu.CompilerParams(
                dimension_semantics=("parallel",),
                vmem_limit_bytes=32 << 20,
            ),
        )(xf, yf, mf)
        if padded:
            out = out.reshape(-1)[:n]
        return out.reshape(orig_shape)

    if reduction != "all":
        raise ValueError(f"unknown reduction: {reduction}")

    # reduction == "all"
    num_parallel = max(1, min(_tensorcores_per_chip(), nblocks))
    nb_per_p = pl.cdiv(nblocks, num_parallel)
    need_mask = (rows_padded % row_block != 0) or (nb_per_p * num_parallel != nblocks)

    def in_map(p, i):
        # Clamp so a (rare) trailing grid point of the parallel split never
        # requests an out-of-range block; its contribution is zeroed in-kernel
        # via the logical (unclamped) row index.
        return (jnp.minimum(p * nb_per_p + i, nblocks - 1), 0)

    in_spec = pl.BlockSpec((row_block, _W), in_map)
    acc_spec = pl.BlockSpec((None, 8, _W), lambda p, i: (p, 0, 0))

    kernel = functools.partial(
        _masked_mse_sum_kernel,
        rows_padded=rows_padded, row_block=row_block,
        nb_per_p=nb_per_p, need_mask=need_mask)

    lpart, mpart = pl.pallas_call(
        kernel,
        out_shape=(
            jax.ShapeDtypeStruct((num_parallel, 8, _W), jnp.float32),
            jax.ShapeDtypeStruct((num_parallel, 8, _W), jnp.float32),
        ),
        grid_spec=pltpu.PrefetchScalarGridSpec(
            num_scalar_prefetch=0,
            grid=(num_parallel, nb_per_p),
            in_specs=[in_spec, in_spec, in_spec],
            out_specs=(acc_spec, acc_spec),
        ),
        compiler_params=pltpu.CompilerParams(
            dimension_semantics=("parallel", "arbitrary"),
            vmem_limit_bytes=32 << 20,
        ),
    )(xf, yf, mf)

    # Single tiny cross-lane reduce in the wrapper.  Matches torch exactly:
    # sum(loss) / sum(mask), no denominator clamp.
    return jnp.sum(lpart) / jnp.sum(mpart)


def _reference(x, y, mask, reduction):
    xf = x.astype(jnp.float32)
    yf = y.astype(jnp.float32)
    mf = mask.astype(jnp.float32)
    loss = (xf - yf) ** 2 * mf
    if reduction == "all":
        return jnp.sum(loss) / jnp.sum(mf)
    return loss.astype(x.dtype)


if __name__ == "__main__":
    def _make(shape, key, dtype=jnp.float32, mask_dtype=jnp.float32):
        kx, ky, km = jax.random.split(key, 3)
        x = jax.random.normal(kx, shape, dtype=jnp.float32).astype(dtype)
        y = jax.random.normal(ky, shape, dtype=jnp.float32).astype(dtype)
        m = (jax.random.uniform(km, shape) > 0.5).astype(mask_dtype)
        return x, y, m

    key = jax.random.PRNGKey(0)
    k1, k2, k3 = jax.random.split(key, 3)

    # Primary small NCHW test (f32, matches PyTorch convention).
    B, C, H, W = 2, 4, 16, 16
    x, y, m = _make((B, C, H, W), k1)
    out_all = jax.block_until_ready(mask_loss(x, y, m, reduction="all"))
    out_none = jax.block_until_ready(mask_loss(x, y, m, reduction="none"))
    assert out_none.shape == (B, C, H, W) and out_none.dtype == x.dtype
    assert jnp.allclose(out_all, _reference(x, y, m, "all"), rtol=1e-4, atol=1e-5)
    assert jnp.allclose(out_none, _reference(x, y, m, "none"), rtol=1e-5, atol=1e-6)

    # Ragged size: exercises minimal padding + in-kernel tail-row masking
    # across multiple row blocks.
    x2, y2, m2 = _make((5, 7, 111, 97), k2)
    out_all2 = jax.block_until_ready(mask_loss(x2, y2, m2, reduction="all"))
    out_none2 = jax.block_until_ready(mask_loss(x2, y2, m2, reduction="none"))
    assert jnp.allclose(out_all2, _reference(x2, y2, m2, "all"),
                        rtol=1e-4, atol=1e-5)
    assert jnp.allclose(out_none2, _reference(x2, y2, m2, "none"),
                        rtol=1e-5, atol=1e-6)

    # bf16 inputs + bf16 mask: native-dtype streaming with in-kernel f32 cast
    # and bf16 output from the 'none' kernel.
    x3, y3, m3 = _make((4, 8, 32, 32), k3, dtype=jnp.bfloat16,
                       mask_dtype=jnp.bfloat16)
    out_all3 = jax.block_until_ready(mask_loss(x3, y3, m3, reduction="all"))
    out_none3 = jax.block_until_ready(mask_loss(x3, y3, m3, reduction="none"))
    assert out_none3.dtype == jnp.bfloat16
    assert jnp.allclose(out_all3, _reference(x3, y3, m3, "all"),
                        rtol=2e-3, atol=1e-3)
    assert jnp.allclose(out_none3.astype(jnp.float32),
                        _reference(x3, y3, m3, "none").astype(jnp.float32),
                        rtol=2e-2, atol=2e-2)

    print("KERNEL_OK")
</pallas_src>

<mosaic_0001>
module attributes {stable_mosaic.version = 11 : i64} {
  func.func @_masked_mse_sum_kernel(%arg0: i32, %arg1: i32, %arg2: memref<8x1024xf32, #tpu.memory_space<vmem>>, %arg3: memref<8x1024xf32, #tpu.memory_space<vmem>>, %arg4: memref<8x1024xf32, #tpu.memory_space<vmem>>, %arg5: memref<1x8x1024xf32, #tpu.memory_space<vmem>>, %arg6: memref<1x8x1024xf32, #tpu.memory_space<vmem>>) attributes {dimension_semantics = [#tpu.dimension_semantics<parallel>, #tpu.dimension_semantics<arbitrary>], iteration_bounds = array<i64: 1, 1>, scalar_prefetch = 0 : i64, scratch_operands = 0 : i64, tpu.core_type = #tpu.core_type<tc>, window_params = [{transform_indices = @transform_0, window_bounds = array<i64: 8, 1024>}, {transform_indices = @transform_1, window_bounds = array<i64: 8, 1024>}, {transform_indices = @transform_2, window_bounds = array<i64: 8, 1024>}, {transform_indices = @transform_3, window_bounds = array<i64: 1, 8, 1024>}, {transform_indices = @transform_4, window_bounds = array<i64: 1, 8, 1024>}]} {
    %c0_i32 = arith.constant 0 : i32
    %0 = arith.cmpi eq, %arg1, %c0_i32 : i32
    %1 = arith.extui %0 : i1 to i32
    %c0_i32_0 = arith.constant 0 : i32
    %2 = arith.cmpi ne, %1, %c0_i32_0 : i32
    scf.if %2 {
      %cst_19 = arith.constant 0.000000e+00 : f32
      %25 = vector.broadcast %cst_19 : f32 to vector<8x1024xf32>
      %c0_20 = arith.constant 0 : index
      %c0_21 = arith.constant 0 : index
      %c0_22 = arith.constant 0 : index
      %26 = vector.load %arg5[%c0_20, %c0_21, %c0_22] : memref<1x8x1024xf32, #tpu.memory_space<vmem>>, vector<1x8x1024xf32>
      %27 = vector.shape_cast %26 : vector<1x8x1024xf32> to vector<8x1024xf32>
      %28 = vector.shape_cast %25 : vector<8x1024xf32> to vector<1x8x1024xf32>
      tpu.vector_store %arg5[%c0_20, %c0_21, %c0_22], %28 {strides = array<i32>} : memref<1x8x1024xf32, #tpu.memory_space<vmem>>, vector<1x8x1024xf32>,
      %cst_23 = arith.constant 0.000000e+00 : f32
      %29 = vector.broadcast %cst_23 : f32 to vector<8x1024xf32>
      %c0_24 = arith.constant 0 : index
      %c0_25 = arith.constant 0 : index
      %c0_26 = arith.constant 0 : index
      %30 = vector.load %arg6[%c0_24, %c0_25, %c0_26] : memref<1x8x1024xf32, #tpu.memory_space<vmem>>, vector<1x8x1024xf32>
      %31 = vector.shape_cast %30 : vector<1x8x1024xf32> to vector<8x1024xf32>
      %32 = vector.shape_cast %29 : vector<8x1024xf32> to vector<1x8x1024xf32>
      tpu.vector_store %arg6[%c0_24, %c0_25, %c0_26], %32 {strides = array<i32>} : memref<1x8x1024xf32, #tpu.memory_space<vmem>>, vector<1x8x1024xf32>,
    } else {
    }
    %c0 = arith.constant 0 : index
    %c0_1 = arith.constant 0 : index
    %3 = vector.load %arg2[%c0, %c0_1] : memref<8x1024xf32, #tpu.memory_space<vmem>>, vector<8x1024xf32>
    %c0_2 = arith.constant 0 : index
    %c0_3 = arith.constant 0 : index
    %4 = vector.load %arg3[%c0_2, %c0_3] : memref<8x1024xf32, #tpu.memory_space<vmem>>, vector<8x1024xf32>
    %c0_4 = arith.constant 0 : index
    %c0_5 = arith.constant 0 : index
    %5 = vector.load %arg4[%c0_4, %c0_5] : memref<8x1024xf32, #tpu.memory_space<vmem>>, vector<8x1024xf32>
    %6 = arith.subf %3, %4 : vector<8x1024xf32>
    %7 = arith.mulf %6, %6 : vector<8x1024xf32>
    %8 = arith.mulf %7, %5 : vector<8x1024xf32>
    %c0_6 = arith.constant 0 : index
    %c0_7 = arith.constant 0 : index
    %c0_8 = arith.constant 0 : index
    %9 = vector.load %arg5[%c0_6, %c0_7, %c0_8] : memref<1x8x1024xf32, #tpu.memory_space<vmem>>, vector<1x8x1024xf32>
    %10 = vector.shape_cast %9 : vector<1x8x1024xf32> to vector<8x1024xf32>
    %11 = vector.shape_cast %8 : vector<8x1024xf32> to vector<1x8x1024xf32>
    %cst = arith.constant dense<0.000000e+00> : vector<8x1024xf32>
    %12 = vector.multi_reduction <add>, %11, %cst [0] : vector<1x8x1024xf32> to vector<8x1024xf32>
    %13 = arith.addf %10, %12 : vector<8x1024xf32>
    %c0_9 = arith.constant 0 : index
    %c0_10 = arith.constant 0 : index
    %c0_11 = arith.constant 0 : index
    %14 = vector.load %arg5[%c0_9, %c0_10, %c0_11] : memref<1x8x1024xf32, #tpu.memory_space<vmem>>, vector<1x8x1024xf32>
    %15 = vector.shape_cast %14 : vector<1x8x1024xf32> to vector<8x1024xf32>
    %16 = vector.shape_cast %13 : vector<8x1024xf32> to vector<1x8x1024xf32>
    tpu.vector_store %arg5[%c0_9, %c0_10, %c0_11], %16 {strides = array<i32>} : memref<1x8x1024xf32, #tpu.memory_space<vmem>>, vector<1x8x1024xf32>,
    %c0_12 = arith.constant 0 : index
    %c0_13 = arith.constant 0 : index
    %c0_14 = arith.constant 0 : index
    %17 = vector.load %arg6[%c0_12, %c0_13, %c0_14] : memref<1x8x1024xf32, #tpu.memory_space<vmem>>, vector<1x8x1024xf32>
    %18 = vector.shape_cast %17 : vector<1x8x1024xf32> to vector<8x1024xf32>
    %19 = vector.shape_cast %5 : vector<8x1024xf32> to vector<1x8x1024xf32>
    %cst_15 = arith.constant dense<0.000000e+00> : vector<8x1024xf32>
    %20 = vector.multi_reduction <add>, %19, %cst_15 [0] : vector<1x8x1024xf32> to vector<8x1024xf32>
    %21 = arith.addf %18, %20 : vector<8x1024xf32>
    %c0_16 = arith.constant 0 : index
    %c0_17 = arith.constant 0 : index
    %c0_18 = arith.constant 0 : index
    %22 = vector.load %arg6[%c0_16, %c0_17, %c0_18] : memref<1x8x1024xf32, #tpu.memory_space<vmem>>, vector<1x8x1024xf32>
    %23 = vector.shape_cast %22 : vector<1x8x1024xf32> to vector<8x1024xf32>
    %24 = vector.shape_cast %21 : vector<8x1024xf32> to vector<1x8x1024xf32>
    tpu.vector_store %arg6[%c0_16, %c0_17, %c0_18], %24 {strides = array<i32>} : memref<1x8x1024xf32, #tpu.memory_space<vmem>>, vector<1x8x1024xf32>,
    return
  }
  func.func @transform_0(%arg0: i32, %arg1: i32) -> (i32, i32) {
    %c1_i32 = arith.constant 1 : i32
    %0 = arith.muli %arg0, %c1_i32 : i32
    %1 = arith.addi %0, %arg1 : i32
    %c0_i32 = arith.constant 0 : i32
    %2 = arith.minsi %1, %c0_i32 : i32
    %c0_i32_0 = arith.constant 0 : i32
    %c0_i32_1 = arith.constant 0 : i32
    return %2, %c0_i32_0 : i32, i32
  }
  func.func @transform_1(%arg0: i32, %arg1: i32) -> (i32, i32) {
    %c1_i32 = arith.constant 1 : i32
    %0 = arith.muli %arg0, %c1_i32 : i32
    %1 = arith.addi %0, %arg1 : i32
    %c0_i32 = arith.constant 0 : i32
    %2 = arith.minsi %1, %c0_i32 : i32
    %c0_i32_0 = arith.constant 0 : i32
    %c0_i32_1 = arith.constant 0 : i32
    return %2, %c0_i32_0 : i32, i32
  }
  func.func @transform_2(%arg0: i32, %arg1: i32) -> (i32, i32) {
    %c1_i32 = arith.constant 1 : i32
    %0 = arith.muli %arg0, %c1_i32 : i32
    %1 = arith.addi %0, %arg1 : i32
    %c0_i32 = arith.constant 0 : i32
    %2 = arith.minsi %1, %c0_i32 : i32
    %c0_i32_0 = arith.constant 0 : i32
    %c0_i32_1 = arith.constant 0 : i32
    return %2, %c0_i32_0 : i32, i32
  }
  func.func @transform_3(%arg0: i32, %arg1: i32) -> (i32, i32, i32) {
    %c0_i32 = arith.constant 0 : i32
    %c0_i32_0 = arith.constant 0 : i32
    %c0_i32_1 = arith.constant 0 : i32
    return %arg0, %c0_i32, %c0_i32_0 : i32, i32, i32
  }
  func.func @transform_4(%arg0: i32, %arg1: i32) -> (i32, i32, i32) {
    %c0_i32 = arith.constant 0 : i32
    %c0_i32_0 = arith.constant 0 : i32
    %c0_i32_1 = arith.constant 0 : i32
    return %arg0, %c0_i32, %c0_i32_0 : i32, i32, i32
  }
}

</mosaic_0001>

<bundles_post_ra>
// kernel: tpu_custom_call.1
= control target key start
LH: loop header
LB: loop body
LE: loop exit
PB: predicated region body
PF: predicated region fallthrough
CT: control target
= control target key end

     0   :  { %10 = vsyncpa [#allocation3], 0  ;;  %s462_s0 = inlined_call_operand.hbm [shape: f32[8,1024], index: 0, kind: input, shape index: {}]   ;;  %s463_s1 = inlined_call_operand.hbm [shape: f32[8,1024], index: 1, kind: input, shape index: {}]   ;;  %s464_s2 = inlined_call_operand.hbm [shape: f32[8,1024], index: 2, kind: input, shape index: {}]   ;;  %s465_s3 = inlined_call_operand.hbm [shape: f32[1,8,1024], index: 3, kind: output, shape index: {0}]   ;;  %s466_s4 = inlined_call_operand.hbm [shape: f32[1,8,1024], index: 4, kind: output, shape index: {1}]  }
   0x1   :  { %11 = vsyncpa [#allocation6], 0 }
   0x2   :  { %12 = vsyncpa [#allocation4], 0 }
   0x3   :  { %13 = vsyncpa [#allocation10], 0  ;;  %s372_s15 = smov [#allocation5]   ;;  %s373_s17 = smov [#allocation2]  }
   0x4   :  { %s42_s16 = sshll.u32 %s372_s15, 4  ;;  %s26_s18 = sshll.u32 %s373_s17, 4  ;;  %s43_s16 = int_to_ptr.vmem [resolvable:$true] %s42_s16  ;;  %s27_s18 = int_to_ptr.vmem [resolvable:$true] %s26_s18 }
   0x5   :  { %s254_s21 = scalar_lea.hbm %s463_s1, 1024 }
   0x6   :  { %p255_p0 = scmp.ne.s32.totalorder %s463_s1, %s254_s21  ;;  %p258_p1 = scmp.lt.u32.totalorder %s254_s21, %s463_s1 }
   0x8   :  { %p260_p2 = pnand %p258_p1, %p255_p0 }
   0xa   :  { %263 = shalt.err (!%p260_p2)
}
   0xb   :  { %s264_s26 = scalar_lea.vmem %s43_s16, 1024  ;;  %p269_p4 = scmp.lt.s32.totalorder %s43_s16, %s43_s16 }
   0xc   :  { %p265_p3 = scmp.ne.s32.totalorder %s43_s16, %s264_s26  ;;  %p270_p5 = scmp.lt.s32.totalorder %s264_s26, %s264_s26 }
   0xe   :  { %p271_p6 = por %p270_p5, %p269_p4 }
  0x10   :  { %p272_p7 = pnand %p271_p6, %p265_p3 }
  0x12   :  { %275 = shalt.err (!%p272_p7)
}
  0x13   :  { %45 = dma.hbm_to_vmem [thread:$0]  %s463_s1, 1024, %s43_s16, [#allocation6]  }
  0x14   :  { %s276_s5 = scalar_lea.hbm %s462_s0, 1024 }
  0x15   :  { %p277_p8 = scmp.ne.s32.totalorder %s462_s0, %s276_s5  ;;  %p280_p9 = scmp.lt.u32.totalorder %s276_s5, %s462_s0 }
  0x17   :  { %p282_p10 = pnand %p280_p9, %p277_p8 }
  0x19   :  { %285 = shalt.err (!%p282_p10)
}
  0x1a   :  { %s286_s10 = scalar_lea.vmem %s27_s18, 1024  ;;  %p291_p12 = scmp.lt.s32.totalorder %s27_s18, %s27_s18 }
  0x1b   :  { %p287_p11 = scmp.ne.s32.totalorder %s27_s18, %s286_s10  ;;  %p292_p13 = scmp.lt.s32.totalorder %s286_s10, %s286_s10 }
  0x1d   :  { %p293_p0 = por %p292_p13, %p291_p12 }
  0x1f   :  { %p294_p1 = pnand %p293_p0, %p287_p11 }
  0x21   :  { %297 = shalt.err (!%p294_p1)
}
  0x22   :  { %29 = dma.hbm_to_vmem [thread:$0]  %s462_s0, 1024, %s27_s18, [#allocation3]  }
  0x23   :  { %s374_s12 = smov [#allocation7]   ;;  %s298_s16 = scalar_lea.hbm %s464_s2, 1024 }
  0x24   :  { %s58_s13 = sshll.u32 %s374_s12, 4  ;;  %p299_p2 = scmp.ne.s32.totalorder %s464_s2, %s298_s16  ;;  %s59_s13 = int_to_ptr.vmem [resolvable:$true] %s58_s13 }
  0x25   :  { %p302_p3 = scmp.lt.u32.totalorder %s298_s16, %s464_s2 }
  0x27   :  { %p304_p4 = pnand %p302_p3, %p299_p2 }
  0x29   :  { %307 = shalt.err (!%p304_p4)
}
  0x2a   :  { %s308_s22 = scalar_lea.vmem %s59_s13, 1024  ;;  %p313_p6 = scmp.lt.s32.totalorder %s59_s13, %s59_s13 }
  0x2b   :  { %p309_p5 = scmp.ne.s32.totalorder %s59_s13, %s308_s22  ;;  %p314_p7 = scmp.lt.s32.totalorder %s308_s22, %s308_s22 }
  0x2d   :  { %p315_p8 = por %p314_p7, %p313_p6 }
  0x2f   :  { %p316_p9 = pnand %p315_p8, %p309_p5 }
  0x31   :  { %319 = shalt.err (!%p316_p9)
}
  0x32   :  { %61 = dma.hbm_to_vmem [thread:$0]  %s464_s2, 1024, %s59_s13, [#allocation6]  }
  0x33   :  { %364 = dma.done.wait [#allocation3], 1024  }
  0x34   :  { %365 = vsyncadd [#allocation3], 4294966272 }
  0x35   :  { %366 = dma.done.wait [#allocation6], 2048  }
  0x36   :  { %367 = vsyncadd [#allocation6], 4294965248  ;;  %v100_v0 = vld [vmem:[#allocation2] sm:$0xff]  ;;  %v101_v4 = vld [vmem:[#allocation2 + $0x8] sm:$0xff]  ;;  %s375_s2 = smov [#allocation9]   ;;  %s376_s24 = smov [#allocation8]  }
  0x37   :  { %v108_v1 = vld [vmem:[#allocation5] sm:$0xff]  ;;  %v109_v5 = vld [vmem:[#allocation5 + $0x8] sm:$0xff]  ;;  %v102_v8 = vld [vmem:[#allocation2 + $0x10] sm:$0xff]  ;;  %s228_s23 = sshll.u32 %s375_s2, 4  ;;  %s218_s25 = sshll.u32 %s376_s24, 4  ;;  %s229_s23 = int_to_ptr.vmem [resolvable:$true] %s228_s23  ;;  %s219_s25 = int_to_ptr.vmem [resolvable:$true] %s218_s25 }
  0x38   :  { %v116_v2 = vld [vmem:[#allocation7] sm:$0xff]  ;;  %v124_v3 = vsub.f32 %v100_v0, %v108_v1  ;;  %v117_v6 = vld [vmem:[#allocation7 + $0x8] sm:$0xff]  ;;  %v125_v7 = vsub.f32 %v101_v4, %v109_v5  ;;  %v110_v9 = vld [vmem:[#allocation5 + $0x10] sm:$0xff]  ;;  %s320_s26 = scalar_lea.vmem %s229_s23, 1024  ;;  %p325_p11 = scmp.lt.s32.totalorder %s229_s23, %s229_s23 }
  0x39   :  { %v118_v10 = vld [vmem:[#allocation7 + $0x10] sm:$0xff]  ;;  %v126_v12 = vsub.f32 %v102_v8, %v110_v9  ;;  %v103_v13 = vld [vmem:[#allocation2 + $0x18] sm:$0xff]  ;;  %204 = vst [vmem:[#allocation9] sm:$0xff] %v116_v2  ;;  %v104_v18 = vld [vmem:[#allocation2 + $0x20] sm:$0xff]  ;;  %p321_p10 = scmp.ne.s32.totalorder %s229_s23, %s320_s26  ;;  %p326_p12 = scmp.lt.s32.totalorder %s320_s26, %s320_s26 }
  0x3a   :  { %v132_v11 = vmul.f32 %v124_v3, %v124_v3  ;;  %v111_v14 = vld [vmem:[#allocation5 + $0x18] sm:$0xff]  ;;  %v133_v16 = vmul.f32 %v125_v7, %v125_v7  ;;  %v112_v19 = vld [vmem:[#allocation5 + $0x20] sm:$0xff]  ;;  %205 = vst [vmem:[#allocation9 + $0x8] sm:$0xff] %v117_v6  ;;  %v105_v24 = vld [vmem:[#allocation2 + $0x28] sm:$0xff] }
  0x3b   :  { %v119_v15 = vld [vmem:[#allocation7 + $0x18] sm:$0xff]  ;;  %v127_v17 = vsub.f32 %v103_v13, %v111_v14  ;;  %v120_v20 = vld [vmem:[#allocation7 + $0x20] sm:$0xff]  ;;  %v134_v22 = vmul.f32 %v126_v12, %v126_v12  ;;  %v128_v23 = vsub.f32 %v104_v18, %v112_v19  ;;  %v113_v25 = vld [vmem:[#allocation5 + $0x28] sm:$0xff]  ;;  %206 = vst [vmem:[#allocation9 + $0x10] sm:$0xff] %v118_v10  ;;  %p327_p13 = por %p326_p12, %p325_p11 }
  0x3c   :  { %v140_v21 = vmul.f32 %v132_v11, %v116_v2  ;;  %v121_v26 = vld [vmem:[#allocation7 + $0x28] sm:$0xff]  ;;  %v141_v27 = vmul.f32 %v133_v16, %v117_v6  ;;  %v129_v29 = vsub.f32 %v105_v24, %v113_v25  ;;  %v106_v30 = vld [vmem:[#allocation2 + $0x30] sm:$0xff]  ;;  %207 = vst [vmem:[#allocation9 + $0x18] sm:$0xff] %v119_v15  ;;  %v107_v35 = vld [vmem:[#allocation2 + $0x38] sm:$0xff] }
  0x3d   :  { %v135_v28 = vmul.f32 %v127_v17, %v127_v17  ;;  %v114_v31 = vld [vmem:[#allocation5 + $0x30] sm:$0xff]  ;;  %v142_v32 = vmul.f32 %v134_v22, %v118_v10  ;;  %v136_v33 = vmul.f32 %v128_v23, %v128_v23  ;;  %v115_v36 = vld [vmem:[#allocation5 + $0x38] sm:$0xff]  ;;  %208 = vst [vmem:[#allocation9 + $0x20] sm:$0xff] %v120_v20  ;;  %209 = vst [vmem:[#allocation9 + $0x28] sm:$0xff] %v121_v26  ;;  %p328_p0 = pnand %p327_p13, %p321_p10 }
  0x3e   :  { %v130_v34 = vsub.f32 %v106_v30, %v114_v31  ;;  %v137_v38 = vmul.f32 %v129_v29, %v129_v29  ;;  %v122_v39 = vld [vmem:[#allocation7 + $0x30] sm:$0xff]  ;;  %v131_v40 = vsub.f32 %v107_v35, %v115_v36  ;;  %172 = vst [vmem:[#allocation8] sm:$0xff] %v140_v21  ;;  %v123_v43 = vld [vmem:[#allocation7 + $0x38] sm:$0xff]  ;;  %173 = vst [vmem:[#allocation8 + $0x8] sm:$0xff] %v141_v27 }
  0x3f   :  { %v143_v37 = vmul.f32 %v135_v28, %v119_v15  ;;  %v144_v41 = vmul.f32 %v136_v33, %v120_v20  ;;  %174 = vst [vmem:[#allocation8 + $0x10] sm:$0xff] %v142_v32  ;;  %210 = vst [vmem:[#allocation9 + $0x30] sm:$0xff] %v122_v39 }
  0x40   :  { %v138_v42 = vmul.f32 %v130_v34, %v130_v34  ;;  %v145_v44 = vmul.f32 %v137_v38, %v121_v26  ;;  %v139_v45 = vmul.f32 %v131_v40, %v131_v40  ;;  %211 = vst [vmem:[#allocation9 + $0x38] sm:$0xff] %v123_v43 }
  0x41   :  { %175 = vst [vmem:[#allocation8 + $0x18] sm:$0xff] %v143_v37  ;;  %176 = vst [vmem:[#allocation8 + $0x20] sm:$0xff] %v144_v41 }
  0x42   :  { %v146_v46 = vmul.f32 %v138_v42, %v122_v39  ;;  %v147_v47 = vmul.f32 %v139_v45, %v123_v43 }
  0x43   :  { %331 = shalt.err (!%p328_p0)
}
  0x44   :  { %s332_s29 = scalar_lea.hbm %s466_s4, 1024 }
  0x45   :  { %p333_p1 = scmp.ne.s32.totalorder %s466_s4, %s332_s29  ;;  %p336_p2 = scmp.lt.u32.totalorder %s332_s29, %s466_s4 }
  0x47   :  { %p338_p3 = pnand %p336_p2, %p333_p1 }
  0x49   :  { %341 = shalt.err (!%p338_p3)
}
  0x4a   :  { %231 = dma.vmem_to_hbm [thread:$0]  %s229_s23, 1024, %s466_s4, [#allocation10]   ;;  %177 = vst [vmem:[#allocation8 + $0x28] sm:$0xff] %v145_v44  ;;  %178 = vst [vmem:[#allocation8 + $0x30] sm:$0xff] %v146_v46 }
  0x4b   :  { %179 = vst [vmem:[#allocation8 + $0x38] sm:$0xff] %v147_v47  ;;  %s342_s10 = scalar_lea.vmem %s219_s25, 1024  ;;  %p347_p5 = scmp.lt.s32.totalorder %s219_s25, %s219_s25 }
  0x4c   :  { %p343_p4 = scmp.ne.s32.totalorder %s219_s25, %s342_s10  ;;  %p348_p6 = scmp.lt.s32.totalorder %s342_s10, %s342_s10 }
  0x4e   :  { %p349_p7 = por %p348_p6, %p347_p5 }
  0x50   :  { %p350_p8 = pnand %p349_p7, %p343_p4 }
  0x52   :  { %353 = shalt.err (!%p350_p8)
}
  0x53   :  { %s354_s12 = scalar_lea.hbm %s465_s3, 1024 }
  0x54   :  { %p355_p9 = scmp.ne.s32.totalorder %s465_s3, %s354_s12  ;;  %p358_p10 = scmp.lt.u32.totalorder %s354_s12, %s465_s3 }
  0x56   :  { %p360_p11 = pnand %p358_p10, %p355_p9 }
  0x58   :  { %363 = shalt.err (!%p360_p11)
}
  0x59   :  { %221 = dma.vmem_to_hbm [thread:$0]  %s219_s25, 1024, %s465_s3, [#allocation4]  }
  0x5a   :  { %368 = dma.done.wait [#allocation4], 1024  }
  0x5b   :  { %369 = vsyncadd [#allocation4], 4294966272 }
  0x5c   :  { %370 = dma.done.wait [#allocation10], 1024  }
  0x5d   :  { %371 = vsyncadd [#allocation10], 4294966272 }
  0x5e   :  { %238 = vsyncpa [#allocation3], 1 }
  0x5f   :  { %239 = vsyncpa [#allocation6], 1 }
  0x60   :  { %240 = vsyncpa [#allocation4], 1 }
  0x61   :  { %241 = vsyncpa [#allocation10], 1 }

</bundles_post_ra>
